<compile_context>
chip_gen: v7x
topology: tpu7x:2x2x1
jax: 0.10.0
libtpu: 0.0.40
codegen_flags: <defaults>
</compile_context>

<pallas_src>
import functools

import jax
import jax.numpy as jnp
from jax.experimental import pallas as pl
from jax.experimental.pallas import tpu as pltpu

_BN_EPS = 1e-5
_VMEM_LIMIT = 48 * 1024 * 1024      # headroom vs v7x's 64 MiB physical VMEM
_FUSED_BUDGET = 16 * 1024 * 1024    # switch to per-layer kernels above this


# --------------------------------------------------------------------------
# Shared math: Linear -> BatchNorm1d (batch statistics) -> activation
# --------------------------------------------------------------------------
def _dense_bn_act(h, w, b, gamma, beta, activation):
    """h: (B, Din) f32; w: (Din, Dout); b/gamma/beta: (1, Dout)."""
    y = jnp.dot(h, w, preferred_element_type=jnp.float32)
    y = y + b
    mu = jnp.mean(y, axis=0, keepdims=True)
    var = jnp.mean(jnp.square(y - mu), axis=0, keepdims=True)
    y = (y - mu) * jax.lax.rsqrt(var + _BN_EPS)   # rsqrt -> EUP slot
    y = y * gamma + beta
    if activation == "relu":
        y = jnp.maximum(y, 0.0)
    elif activation == "tanh":
        y = jnp.tanh(y)
    return y


# --------------------------------------------------------------------------
# Fully-fused single-kernel VAE forward (used when everything fits in VMEM)
# --------------------------------------------------------------------------
def _vae_fused_kernel(n_enc, n_dec, *refs):
    idx = 0
    x_ref = refs[idx]; idx += 1
    eps_ref = refs[idx]; idx += 1
    enc = []
    for _ in range(n_enc):
        enc.append(refs[idx:idx + 4]); idx += 4
    wm_ref, bm_ref, wv_ref, bv_ref = refs[idx:idx + 4]; idx += 4
    dec = []
    for _ in range(n_dec):
        dec.append(refs[idx:idx + 4]); idx += 4
    recon_ref, means_ref, logvar_ref, z_ref = refs[idx:idx + 4]

    f32 = lambda r: r[...].astype(jnp.float32)

    h = f32(x_ref)
    for (w_r, b_r, g_r, bb_r) in enc:
        h = _dense_bn_act(h, f32(w_r), f32(b_r), f32(g_r), f32(bb_r), "relu")

    means = jnp.dot(h, f32(wm_ref), preferred_element_type=jnp.float32)
    means = means + f32(bm_ref)
    log_var = jnp.dot(h, f32(wv_ref), preferred_element_type=jnp.float32)
    log_var = log_var + f32(bv_ref)
    z = means + f32(eps_ref) * jnp.exp(0.5 * log_var)

    d = z
    for i, (w_r, b_r, g_r, bb_r) in enumerate(dec):
        act = "relu" if i + 1 < n_dec else "tanh"
        d = _dense_bn_act(d, f32(w_r), f32(b_r), f32(g_r), f32(bb_r), act)

    recon_ref[...] = d.astype(recon_ref.dtype)
    means_ref[...] = means.astype(means_ref.dtype)
    logvar_ref[...] = log_var.astype(logvar_ref.dtype)
    z_ref[...] = z.astype(z_ref.dtype)


def _flatten_params(params):
    flat = []
    for lyr in params["encoder"]:
        flat += [lyr["w"], lyr["b"], lyr["gamma"], lyr["beta"]]
    flat += [params["wm"], params["bm"], params["wv"], params["bv"]]
    for lyr in params["decoder"]:
        flat += [lyr["w"], lyr["b"], lyr["gamma"], lyr["beta"]]
    return flat


def _fused_fits(x, params):
    """Rough (padded) VMEM estimate for the fully-fused path."""
    B = max(x.shape[0], 8)
    widths = [x.shape[1]]
    for lyr in params["encoder"]:
        widths.append(lyr["w"].shape[1])
    widths.append(params["wm"].shape[1])
    for lyr in params["decoder"]:
        widths.append(lyr["w"].shape[1])
    act_bytes = 4 * B * sum(max(w, 128) for w in widths) * 2
    param_elems = sum(a.size for a in _flatten_params(params))
    param_bytes = 4 * param_elems * 2
    return act_bytes + param_bytes < _FUSED_BUDGET


def _vae_fused(x, params, eps):
    enc, dec = params["encoder"], params["decoder"]
    flat = [x, eps] + _flatten_params(params)
    B = x.shape[0]
    latent = params["wm"].shape[1]
    out_dim = dec[-1]["w"].shape[1]
    kernel = functools.partial(_vae_fused_kernel, len(enc), len(dec))
    vmem = pl.BlockSpec(memory_space=pltpu.MemorySpace.VMEM)
    out_shapes = (
        jax.ShapeDtypeStruct((B, out_dim), x.dtype),
        jax.ShapeDtypeStruct((B, latent), x.dtype),
        jax.ShapeDtypeStruct((B, latent), x.dtype),
        jax.ShapeDtypeStruct((B, latent), x.dtype),
    )
    return pl.pallas_call(
        kernel,
        out_shape=out_shapes,
        in_specs=[vmem] * len(flat),
        out_specs=(vmem, vmem, vmem, vmem),
        compiler_params=pltpu.CompilerParams(vmem_limit_bytes=_VMEM_LIMIT),
    )(*flat)


# --------------------------------------------------------------------------
# Fallback path: per-layer fused kernels (feature-tiled along the lane axis)
# --------------------------------------------------------------------------
def _feature_tile(dout, max_tile=512):
    """Lane-dense feature tile: full extent for small dims, otherwise the
    largest multiple of 128 (<= max_tile) that divides dout."""
    if dout <= max_tile or dout % 128 != 0:
        return dout
    t = (max_tile // 128) * 128
    while dout % t:
        t -= 128
    return max(t, 128)


def _dense_bn_act_kernel(x_ref, w_ref, b_ref, g_ref, bb_ref, o_ref, *,
                         activation):
    y = _dense_bn_act(x_ref[...].astype(jnp.float32),
                      w_ref[...].astype(jnp.float32),
                      b_ref[...].astype(jnp.float32),
                      g_ref[...].astype(jnp.float32),
                      bb_ref[...].astype(jnp.float32),
                      activation)
    o_ref[...] = y.astype(o_ref.dtype)


def dense_bn_act(x, w, b, gamma, beta, activation):
    """x: (B, Din), w: (Din, Dout), b/gamma/beta: (1, Dout)."""
    B, din = x.shape
    dout = w.shape[1]
    tn = _feature_tile(dout)
    grid = (dout // tn,)
    row = lambda j: (0, j)
    kernel = functools.partial(_dense_bn_act_kernel, activation=activation)
    return pl.pallas_call(
        kernel,
        out_shape=jax.ShapeDtypeStruct((B, dout), x.dtype),
        grid_spec=pltpu.PrefetchScalarGridSpec(
            num_scalar_prefetch=0,
            grid=grid,
            in_specs=[
                pl.BlockSpec((B, din), lambda j: (0, 0)),  # full batch, full Din
                pl.BlockSpec((din, tn), row),
                pl.BlockSpec((1, tn), row),
                pl.BlockSpec((1, tn), row),
                pl.BlockSpec((1, tn), row),
            ],
            out_specs=pl.BlockSpec((B, tn), row),
        ),
        compiler_params=pltpu.CompilerParams(
            dimension_semantics=("parallel",),
            vmem_limit_bytes=_VMEM_LIMIT,
        ),
    )(x, w, b, gamma, beta)


def _latent_kernel(h_ref, wm_ref, bm_ref, wv_ref, bv_ref, eps_ref,
                   means_ref, logvar_ref, z_ref):
    h = h_ref[...].astype(jnp.float32)
    means = jnp.dot(h, wm_ref[...].astype(jnp.float32),
                    preferred_element_type=jnp.float32)
    means = means + bm_ref[...].astype(jnp.float32)
    log_var = jnp.dot(h, wv_ref[...].astype(jnp.float32),
                      preferred_element_type=jnp.float32)
    log_var = log_var + bv_ref[...].astype(jnp.float32)
    z = means + eps_ref[...].astype(jnp.float32) * jnp.exp(0.5 * log_var)
    means_ref[...] = means.astype(means_ref.dtype)
    logvar_ref[...] = log_var.astype(logvar_ref.dtype)
    z_ref[...] = z.astype(z_ref.dtype)


def latent_heads(h, wm, bm, wv, bv, eps):
    B, din = h.shape
    latent = wm.shape[1]
    tl = _feature_tile(latent)
    grid = (latent // tl,)
    row = lambda j: (0, j)
    out_sds = jax.ShapeDtypeStruct((B, latent), h.dtype)
    return pl.pallas_call(
        _latent_kernel,
        out_shape=(out_sds, out_sds, out_sds),
        grid_spec=pltpu.PrefetchScalarGridSpec(
            num_scalar_prefetch=0,
            grid=grid,
            in_specs=[
                pl.BlockSpec((B, din), lambda j: (0, 0)),
                pl.BlockSpec((din, tl), row),
                pl.BlockSpec((1, tl), row),
                pl.BlockSpec((din, tl), row),
                pl.BlockSpec((1, tl), row),
                pl.BlockSpec((B, tl), row),
            ],
            out_specs=(
                pl.BlockSpec((B, tl), row),
                pl.BlockSpec((B, tl), row),
                pl.BlockSpec((B, tl), row),
            ),
        ),
        compiler_params=pltpu.CompilerParams(
            dimension_semantics=("parallel",),
            vmem_limit_bytes=_VMEM_LIMIT,
        ),
    )(h, wm, bm, wv, bv, eps)


# --------------------------------------------------------------------------
# Full VAE forward
# --------------------------------------------------------------------------
def vae_forward(x, params, eps, c=None):
    """Returns (recon_x, means, log_var, z), matching VAE.forward."""
    if c is None and _fused_fits(x, params):
        return _vae_fused(x, params, eps)

    # Per-layer fused kernels (also used for the conditional path).
    h = x if c is None else jnp.concatenate([x, c], axis=-1)
    for lyr in params["encoder"]:
        h = dense_bn_act(h, lyr["w"], lyr["b"], lyr["gamma"], lyr["beta"],
                         "relu")
    means, log_var, z = latent_heads(h, params["wm"], params["bm"],
                                     params["wv"], params["bv"], eps)
    d = z if c is None else jnp.concatenate([z, c], axis=-1)
    n_dec = len(params["decoder"])
    for i, lyr in enumerate(params["decoder"]):
        act = "relu" if i + 1 < n_dec else "tanh"
        d = dense_bn_act(d, lyr["w"], lyr["b"], lyr["gamma"], lyr["beta"], act)
    return d, means, log_var, z


# --------------------------------------------------------------------------
# Parameter init (weights stored as (Din, Dout); biases/BN params as (1, Dout))
# --------------------------------------------------------------------------
def init_params(key, encoder_layer_sizes, latent_size, decoder_layer_sizes):
    def linear(k, din, dout, scale=0.2):
        kw, kb = jax.random.split(k)
        w = scale * jax.random.normal(kw, (din, dout), jnp.float32)
        b = scale * jax.random.normal(kb, (1, dout), jnp.float32)
        return w, b

    n_keys = (len(encoder_layer_sizes) - 1) + 2 + len(decoder_layer_sizes)
    keys = list(jax.random.split(key, n_keys))
    params = {"encoder": [], "decoder": []}

    for din, dout in zip(encoder_layer_sizes[:-1], encoder_layer_sizes[1:]):
        w, b = linear(keys.pop(0), din, dout)
        params["encoder"].append(dict(
            w=w, b=b,
            gamma=jnp.ones((1, dout), jnp.float32),
            beta=jnp.zeros((1, dout), jnp.float32)))

    wm, bm = linear(keys.pop(0), encoder_layer_sizes[-1], latent_size)
    wv, bv = linear(keys.pop(0), encoder_layer_sizes[-1], latent_size)
    params.update(wm=wm, bm=bm, wv=wv, bv=bv)

    din = latent_size
    for dout in decoder_layer_sizes:
        w, b = linear(keys.pop(0), din, dout)
        params["decoder"].append(dict(
            w=w, b=b,
            gamma=jnp.ones((1, dout), jnp.float32),
            beta=jnp.zeros((1, dout), jnp.float32)))
        din = dout
    return params


# --------------------------------------------------------------------------
# Pure-JAX reference
# --------------------------------------------------------------------------
def _ref_forward(x, params, eps, c=None):
    def bn(y, gamma, beta):
        mu = jnp.mean(y, axis=0, keepdims=True)
        var = jnp.mean(jnp.square(y - mu), axis=0, keepdims=True)
        return (y - mu) / jnp.sqrt(var + _BN_EPS) * gamma + beta

    h = x if c is None else jnp.concatenate([x, c], axis=-1)
    for lyr in params["encoder"]:
        h = jnp.maximum(bn(h @ lyr["w"] + lyr["b"], lyr["gamma"], lyr["beta"]),
                        0.0)
    means = h @ params["wm"] + params["bm"]
    log_var = h @ params["wv"] + params["bv"]
    z = means + eps * jnp.exp(0.5 * log_var)
    d = z if c is None else jnp.concatenate([z, c], axis=-1)
    n_dec = len(params["decoder"])
    for i, lyr in enumerate(params["decoder"]):
        y = bn(d @ lyr["w"] + lyr["b"], lyr["gamma"], lyr["beta"])
        d = jnp.maximum(y, 0.0) if i + 1 < n_dec else jnp.tanh(y)
    return d, means, log_var, z


if __name__ == "__main__":
    key = jax.random.PRNGKey(0)
    k_param, k_x, k_eps = jax.random.split(key, 3)

    # Small shapes consistent with the module (conditional=False).
    batch = 8
    encoder_layer_sizes = [32, 16]
    latent_size = 8
    decoder_layer_sizes = [16, 32]

    params = init_params(k_param, encoder_layer_sizes, latent_size,
                         decoder_layer_sizes)
    x = jax.random.normal(k_x, (batch, encoder_layer_sizes[0]), jnp.float32)
    eps = jax.random.normal(k_eps, (batch, latent_size), jnp.float32)

    recon_x, means, log_var, z = vae_forward(x, params, eps)
    recon_x = jax.block_until_ready(recon_x)
    means = jax.block_until_ready(means)
    log_var = jax.block_until_ready(log_var)
    z = jax.block_until_ready(z)

    ref = _ref_forward(x, params, eps)
    names = ("recon_x", "means", "log_var", "z")
    for name, got, want in zip(names, (recon_x, means, log_var, z), ref):
        assert jnp.allclose(got, want, atol=2e-4, rtol=2e-4), (
            f"{name} mismatch: max abs err "
            f"{float(jnp.max(jnp.abs(got - want)))}")

    print("KERNEL_OK")
</pallas_src>

<mosaic_0001>
module attributes {stable_mosaic.version = 11 : i64} {
  func.func @_vae_fused_kernel(%arg0: memref<8x32xf32, #tpu.memory_space<vmem>>, %arg1: memref<8x8xf32, #tpu.memory_space<vmem>>, %arg2: memref<32x16xf32, #tpu.memory_space<vmem>>, %arg3: memref<1x16xf32, #tpu.memory_space<vmem>>, %arg4: memref<1x16xf32, #tpu.memory_space<vmem>>, %arg5: memref<1x16xf32, #tpu.memory_space<vmem>>, %arg6: memref<16x8xf32, #tpu.memory_space<vmem>>, %arg7: memref<1x8xf32, #tpu.memory_space<vmem>>, %arg8: memref<16x8xf32, #tpu.memory_space<vmem>>, %arg9: memref<1x8xf32, #tpu.memory_space<vmem>>, %arg10: memref<8x16xf32, #tpu.memory_space<vmem>>, %arg11: memref<1x16xf32, #tpu.memory_space<vmem>>, %arg12: memref<1x16xf32, #tpu.memory_space<vmem>>, %arg13: memref<1x16xf32, #tpu.memory_space<vmem>>, %arg14: memref<16x32xf32, #tpu.memory_space<vmem>>, %arg15: memref<1x32xf32, #tpu.memory_space<vmem>>, %arg16: memref<1x32xf32, #tpu.memory_space<vmem>>, %arg17: memref<1x32xf32, #tpu.memory_space<vmem>>, %arg18: memref<8x32xf32, #tpu.memory_space<vmem>>, %arg19: memref<8x8xf32, #tpu.memory_space<vmem>>, %arg20: memref<8x8xf32, #tpu.memory_space<vmem>>, %arg21: memref<8x8xf32, #tpu.memory_space<vmem>>) attributes {dimension_semantics = [], scalar_prefetch = 0 : i64, scratch_operands = 0 : i64, tpu.core_type = #tpu.core_type<tc>} {
    %c0 = arith.constant 0 : index
    %c0_0 = arith.constant 0 : index
    %0 = vector.load %arg0[%c0, %c0_0] : memref<8x32xf32, #tpu.memory_space<vmem>>, vector<8x32xf32>
    %c0_1 = arith.constant 0 : index
    %c0_2 = arith.constant 0 : index
    %1 = vector.load %arg2[%c0_1, %c0_2] : memref<32x16xf32, #tpu.memory_space<vmem>>, vector<32x16xf32>
    %c0_3 = arith.constant 0 : index
    %c0_4 = arith.constant 0 : index
    %2 = vector.load %arg3[%c0_3, %c0_4] : memref<1x16xf32, #tpu.memory_space<vmem>>, vector<1x16xf32>
    %c0_5 = arith.constant 0 : index
    %c0_6 = arith.constant 0 : index
    %3 = vector.load %arg4[%c0_5, %c0_6] : memref<1x16xf32, #tpu.memory_space<vmem>>, vector<1x16xf32>
    %c0_7 = arith.constant 0 : index
    %c0_8 = arith.constant 0 : index
    %4 = vector.load %arg5[%c0_7, %c0_8] : memref<1x16xf32, #tpu.memory_space<vmem>>, vector<1x16xf32>
    %cst = arith.constant dense<0.000000e+00> : vector<8x16xf32>
    %5 = tpu.matmul %0, %1, %cst {dimension_numbers = #tpu.dot_dimension_numbers<[1], [0], [0], [1], [0, 0, 1, 1], [], []>} : vector<8x32xf32>, vector<32x16xf32>, vector<8x16xf32> -> vector<8x16xf32>
    %6 = vector.broadcast %2 : vector<1x16xf32> to vector<8x16xf32>
    %7 = arith.addf %5, %6 : vector<8x16xf32>
    %cst_9 = arith.constant dense<0.000000e+00> : vector<16xf32>
    %8 = vector.multi_reduction <add>, %7, %cst_9 [0] : vector<8x16xf32> to vector<16xf32>
    %9 = vector.shape_cast %8 : vector<16xf32> to vector<1x16xf32>
    %cst_10 = arith.constant 8.000000e+00 : f32
    %10 = vector.broadcast %cst_10 : f32 to vector<1x16xf32>
    %11 = arith.divf %9, %10 : vector<1x16xf32>
    %12 = vector.broadcast %11 : vector<1x16xf32> to vector<8x16xf32>
    %13 = arith.subf %7, %12 : vector<8x16xf32>
    %14 = arith.mulf %13, %13 : vector<8x16xf32>
    %cst_11 = arith.constant dense<0.000000e+00> : vector<16xf32>
    %15 = vector.multi_reduction <add>, %14, %cst_11 [0] : vector<8x16xf32> to vector<16xf32>
    %16 = vector.shape_cast %15 : vector<16xf32> to vector<1x16xf32>
    %cst_12 = arith.constant 8.000000e+00 : f32
    %17 = vector.broadcast %cst_12 : f32 to vector<1x16xf32>
    %18 = arith.divf %16, %17 : vector<1x16xf32>
    %19 = vector.broadcast %11 : vector<1x16xf32> to vector<8x16xf32>
    %20 = arith.subf %7, %19 : vector<8x16xf32>
    %cst_13 = arith.constant 9.99999974E-6 : f32
    %21 = vector.broadcast %cst_13 : f32 to vector<1x16xf32>
    %22 = arith.addf %18, %21 : vector<1x16xf32>
    %23 = math.rsqrt %22 : vector<1x16xf32>
    %24 = vector.broadcast %23 : vector<1x16xf32> to vector<8x16xf32>
    %25 = arith.mulf %20, %24 : vector<8x16xf32>
    %26 = vector.broadcast %3 : vector<1x16xf32> to vector<8x16xf32>
    %27 = arith.mulf %25, %26 : vector<8x16xf32>
    %28 = vector.broadcast %4 : vector<1x16xf32> to vector<8x16xf32>
    %29 = arith.addf %27, %28 : vector<8x16xf32>
    %cst_14 = arith.constant 0.000000e+00 : f32
    %30 = vector.broadcast %cst_14 : f32 to vector<8x16xf32>
    %31 = arith.maximumf %29, %30 : vector<8x16xf32>
    %c0_15 = arith.constant 0 : index
    %c0_16 = arith.constant 0 : index
    %32 = vector.load %arg6[%c0_15, %c0_16] : memref<16x8xf32, #tpu.memory_space<vmem>>, vector<16x8xf32>
    %cst_17 = arith.constant dense<0.000000e+00> : vector<8x8xf32>
    %33 = tpu.matmul %31, %32, %cst_17 {dimension_numbers = #tpu.dot_dimension_numbers<[1], [0], [0], [1], [0, 0, 1, 1], [], []>} : vector<8x16xf32>, vector<16x8xf32>, vector<8x8xf32> -> vector<8x8xf32>
    %c0_18 = arith.constant 0 : index
    %c0_19 = arith.constant 0 : index
    %34 = vector.load %arg7[%c0_18, %c0_19] : memref<1x8xf32, #tpu.memory_space<vmem>>, vector<1x8xf32>
    %35 = vector.broadcast %34 : vector<1x8xf32> to vector<8x8xf32>
    %36 = arith.addf %33, %35 : vector<8x8xf32>
    %c0_20 = arith.constant 0 : index
    %c0_21 = arith.constant 0 : index
    %37 = vector.load %arg8[%c0_20, %c0_21] : memref<16x8xf32, #tpu.memory_space<vmem>>, vector<16x8xf32>
    %cst_22 = arith.constant dense<0.000000e+00> : vector<8x8xf32>
    %38 = tpu.matmul %31, %37, %cst_22 {dimension_numbers = #tpu.dot_dimension_numbers<[1], [0], [0], [1], [0, 0, 1, 1], [], []>} : vector<8x16xf32>, vector<16x8xf32>, vector<8x8xf32> -> vector<8x8xf32>
    %c0_23 = arith.constant 0 : index
    %c0_24 = arith.constant 0 : index
    %39 = vector.load %arg9[%c0_23, %c0_24] : memref<1x8xf32, #tpu.memory_space<vmem>>, vector<1x8xf32>
    %40 = vector.broadcast %39 : vector<1x8xf32> to vector<8x8xf32>
    %41 = arith.addf %38, %40 : vector<8x8xf32>
    %c0_25 = arith.constant 0 : index
    %c0_26 = arith.constant 0 : index
    %42 = vector.load %arg1[%c0_25, %c0_26] : memref<8x8xf32, #tpu.memory_space<vmem>>, vector<8x8xf32>
    %cst_27 = arith.constant 5.000000e-01 : f32
    %43 = vector.broadcast %cst_27 : f32 to vector<8x8xf32>
    %44 = arith.mulf %43, %41 : vector<8x8xf32>
    %45 = math.exp %44 : vector<8x8xf32>
    %46 = arith.mulf %42, %45 : vector<8x8xf32>
    %47 = arith.addf %36, %46 : vector<8x8xf32>
    %c0_28 = arith.constant 0 : index
    %c0_29 = arith.constant 0 : index
    %48 = vector.load %arg10[%c0_28, %c0_29] : memref<8x16xf32, #tpu.memory_space<vmem>>, vector<8x16xf32>
    %c0_30 = arith.constant 0 : index
    %c0_31 = arith.constant 0 : index
    %49 = vector.load %arg11[%c0_30, %c0_31] : memref<1x16xf32, #tpu.memory_space<vmem>>, vector<1x16xf32>
    %c0_32 = arith.constant 0 : index
    %c0_33 = arith.constant 0 : index
    %50 = vector.load %arg12[%c0_32, %c0_33] : memref<1x16xf32, #tpu.memory_space<vmem>>, vector<1x16xf32>
    %c0_34 = arith.constant 0 : index
    %c0_35 = arith.constant 0 : index
    %51 = vector.load %arg13[%c0_34, %c0_35] : memref<1x16xf32, #tpu.memory_space<vmem>>, vector<1x16xf32>
    %cst_36 = arith.constant dense<0.000000e+00> : vector<8x16xf32>
    %52 = tpu.matmul %47, %48, %cst_36 {dimension_numbers = #tpu.dot_dimension_numbers<[1], [0], [0], [1], [0, 0, 1, 1], [], []>} : vector<8x8xf32>, vector<8x16xf32>, vector<8x16xf32> -> vector<8x16xf32>
    %53 = vector.broadcast %49 : vector<1x16xf32> to vector<8x16xf32>
    %54 = arith.addf %52, %53 : vector<8x16xf32>
    %cst_37 = arith.constant dense<0.000000e+00> : vector<16xf32>
    %55 = vector.multi_reduction <add>, %54, %cst_37 [0] : vector<8x16xf32> to vector<16xf32>
    %56 = vector.shape_cast %55 : vector<16xf32> to vector<1x16xf32>
    %cst_38 = arith.constant 8.000000e+00 : f32
    %57 = vector.broadcast %cst_38 : f32 to vector<1x16xf32>
    %58 = arith.divf %56, %57 : vector<1x16xf32>
    %59 = vector.broadcast %58 : vector<1x16xf32> to vector<8x16xf32>
    %60 = arith.subf %54, %59 : vector<8x16xf32>
    %61 = arith.mulf %60, %60 : vector<8x16xf32>
    %cst_39 = arith.constant dense<0.000000e+00> : vector<16xf32>
    %62 = vector.multi_reduction <add>, %61, %cst_39 [0] : vector<8x16xf32> to vector<16xf32>
    %63 = vector.shape_cast %62 : vector<16xf32> to vector<1x16xf32>
    %cst_40 = arith.constant 8.000000e+00 : f32
    %64 = vector.broadcast %cst_40 : f32 to vector<1x16xf32>
    %65 = arith.divf %63, %64 : vector<1x16xf32>
    %66 = vector.broadcast %58 : vector<1x16xf32> to vector<8x16xf32>
    %67 = arith.subf %54, %66 : vector<8x16xf32>
    %cst_41 = arith.constant 9.99999974E-6 : f32
    %68 = vector.broadcast %cst_41 : f32 to vector<1x16xf32>
    %69 = arith.addf %65, %68 : vector<1x16xf32>
    %70 = math.rsqrt %69 : vector<1x16xf32>
    %71 = vector.broadcast %70 : vector<1x16xf32> to vector<8x16xf32>
    %72 = arith.mulf %67, %71 : vector<8x16xf32>
    %73 = vector.broadcast %50 : vector<1x16xf32> to vector<8x16xf32>
    %74 = arith.mulf %72, %73 : vector<8x16xf32>
    %75 = vector.broadcast %51 : vector<1x16xf32> to vector<8x16xf32>
    %76 = arith.addf %74, %75 : vector<8x16xf32>
    %cst_42 = arith.constant 0.000000e+00 : f32
    %77 = vector.broadcast %cst_42 : f32 to vector<8x16xf32>
    %78 = arith.maximumf %76, %77 : vector<8x16xf32>
    %c0_43 = arith.constant 0 : index
    %c0_44 = arith.constant 0 : index
    %79 = vector.load %arg14[%c0_43, %c0_44] : memref<16x32xf32, #tpu.memory_space<vmem>>, vector<16x32xf32>
    %c0_45 = arith.constant 0 : index
    %c0_46 = arith.constant 0 : index
    %80 = vector.load %arg15[%c0_45, %c0_46] : memref<1x32xf32, #tpu.memory_space<vmem>>, vector<1x32xf32>
    %c0_47 = arith.constant 0 : index
    %c0_48 = arith.constant 0 : index
    %81 = vector.load %arg16[%c0_47, %c0_48] : memref<1x32xf32, #tpu.memory_space<vmem>>, vector<1x32xf32>
    %c0_49 = arith.constant 0 : index
    %c0_50 = arith.constant 0 : index
    %82 = vector.load %arg17[%c0_49, %c0_50] : memref<1x32xf32, #tpu.memory_space<vmem>>, vector<1x32xf32>
    %cst_51 = arith.constant dense<0.000000e+00> : vector<8x32xf32>
    %83 = tpu.matmul %78, %79, %cst_51 {dimension_numbers = #tpu.dot_dimension_numbers<[1], [0], [0], [1], [0, 0, 1, 1], [], []>} : vector<8x16xf32>, vector<16x32xf32>, vector<8x32xf32> -> vector<8x32xf32>
    %84 = vector.broadcast %80 : vector<1x32xf32> to vector<8x32xf32>
    %85 = arith.addf %83, %84 : vector<8x32xf32>
    %cst_52 = arith.constant dense<0.000000e+00> : vector<32xf32>
    %86 = vector.multi_reduction <add>, %85, %cst_52 [0] : vector<8x32xf32> to vector<32xf32>
    %87 = vector.shape_cast %86 : vector<32xf32> to vector<1x32xf32>
    %cst_53 = arith.constant 8.000000e+00 : f32
    %88 = vector.broadcast %cst_53 : f32 to vector<1x32xf32>
    %89 = arith.divf %87, %88 : vector<1x32xf32>
    %90 = vector.broadcast %89 : vector<1x32xf32> to vector<8x32xf32>
    %91 = arith.subf %85, %90 : vector<8x32xf32>
    %92 = arith.mulf %91, %91 : vector<8x32xf32>
    %cst_54 = arith.constant dense<0.000000e+00> : vector<32xf32>
    %93 = vector.multi_reduction <add>, %92, %cst_54 [0] : vector<8x32xf32> to vector<32xf32>
    %94 = vector.shape_cast %93 : vector<32xf32> to vector<1x32xf32>
    %cst_55 = arith.constant 8.000000e+00 : f32
    %95 = vector.broadcast %cst_55 : f32 to vector<1x32xf32>
    %96 = arith.divf %94, %95 : vector<1x32xf32>
    %97 = vector.broadcast %89 : vector<1x32xf32> to vector<8x32xf32>
    %98 = arith.subf %85, %97 : vector<8x32xf32>
    %cst_56 = arith.constant 9.99999974E-6 : f32
    %99 = vector.broadcast %cst_56 : f32 to vector<1x32xf32>
    %100 = arith.addf %96, %99 : vector<1x32xf32>
    %101 = math.rsqrt %100 : vector<1x32xf32>
    %102 = vector.broadcast %101 : vector<1x32xf32> to vector<8x32xf32>
    %103 = arith.mulf %98, %102 : vector<8x32xf32>
    %104 = vector.broadcast %81 : vector<1x32xf32> to vector<8x32xf32>
    %105 = arith.mulf %103, %104 : vector<8x32xf32>
    %106 = vector.broadcast %82 : vector<1x32xf32> to vector<8x32xf32>
    %107 = arith.addf %105, %106 : vector<8x32xf32>
    %108 = math.tanh %107 : vector<8x32xf32>
    %c0_57 = arith.constant 0 : index
    %c0_58 = arith.constant 0 : index
    %109 = vector.load %arg18[%c0_57, %c0_58] : memref<8x32xf32, #tpu.memory_space<vmem>>, vector<8x32xf32>
    tpu.vector_store %arg18[%c0_57, %c0_58], %108 {strides = array<i32>} : memref<8x32xf32, #tpu.memory_space<vmem>>, vector<8x32xf32>,
    %c0_59 = arith.constant 0 : index
    %c0_60 = arith.constant 0 : index
    %110 = vector.load %arg19[%c0_59, %c0_60] : memref<8x8xf32, #tpu.memory_space<vmem>>, vector<8x8xf32>
    tpu.vector_store %arg19[%c0_59, %c0_60], %36 {strides = array<i32>} : memref<8x8xf32, #tpu.memory_space<vmem>>, vector<8x8xf32>,
    %c0_61 = arith.constant 0 : index
    %c0_62 = arith.constant 0 : index
    %111 = vector.load %arg20[%c0_61, %c0_62] : memref<8x8xf32, #tpu.memory_space<vmem>>, vector<8x8xf32>
    tpu.vector_store %arg20[%c0_61, %c0_62], %41 {strides = array<i32>} : memref<8x8xf32, #tpu.memory_space<vmem>>, vector<8x8xf32>,
    %c0_63 = arith.constant 0 : index
    %c0_64 = arith.constant 0 : index
    %112 = vector.load %arg21[%c0_63, %c0_64] : memref<8x8xf32, #tpu.memory_space<vmem>>, vector<8x8xf32>
    tpu.vector_store %arg21[%c0_63, %c0_64], %47 {strides = array<i32>} : memref<8x8xf32, #tpu.memory_space<vmem>>, vector<8x8xf32>,
    return
  }
}

</mosaic_0001>

<bundles_post_ra>
// kernel: tpu_custom_call.1
= control target key start
LH: loop header
LB: loop body
LE: loop exit
PB: predicated region body
PF: predicated region fallthrough
CT: control target
= control target key end

     0   :  { %s1110_s0 = inlined_call_operand.vmem [shape: f32[8,32], index: 0, kind: input, shape index: {}]   ;;  %s1111_s1 = inlined_call_operand.vmem [shape: f32[8,8], index: 1, kind: input, shape index: {}]   ;;  %s1112_s2 = inlined_call_operand.vmem [shape: f32[32,16], index: 2, kind: input, shape index: {}]   ;;  %s1113_s3 = inlined_call_operand.vmem [shape: f32[1,16], index: 3, kind: input, shape index: {}]   ;;  %s1114_s4 = inlined_call_operand.vmem [shape: f32[1,16], index: 4, kind: input, shape index: {}]   ;;  %s1115_s5 = inlined_call_operand.vmem [shape: f32[1,16], index: 5, kind: input, shape index: {}]   ;;  %s1116_s6 = inlined_call_operand.vmem [shape: f32[16,8], index: 6, kind: input, shape index: {}]   ;;  %s1117_s7 = inlined_call_operand.vmem [shape: f32[1,8], index: 7, kind: input, shape index: {}]   ;;  %s1118_s8 = inlined_call_operand.vmem [shape: f32[16,8], index: 8, kind: input, shape index: {}]   ;;  %s1119_s9 = inlined_call_operand.vmem [shape: f32[1,8], index: 9, kind: input, shape index: {}]   ;;  %s1120_s10 = inlined_call_operand.vmem [shape: f32[8,16], index: 10, kind: input, shape index: {}]   ;;  %s1121_s11 = inlined_call_operand.vmem [shape: f32[1,16], index: 11, kind: input, shape index: {}]   ;;  %s1122_s12 = inlined_call_operand.vmem [shape: f32[1,16], index: 12, kind: input, shape index: {}]   ;;  %s1123_s13 = inlined_call_operand.vmem [shape: f32[1,16], index: 13, kind: input, shape index: {}]   ;;  %s1124_s14 = inlined_call_operand.vmem [shape: f32[16,32], index: 14, kind: input, shape index: {}]   ;;  %s1125_s15 = inlined_call_operand.vmem [shape: f32[1,32], index: 15, kind: input, shape index: {}]   ;;  %s1126_s16 = inlined_call_operand.vmem [shape: f32[1,32], index: 16, kind: input, shape index: {}]   ;;  %s1127_s17 = inlined_call_operand.vmem [shape: f32[1,32], index: 17, kind: input, shape index: {}]   ;;  %s1128_s18 = inlined_call_operand.hbm [shape: f32[8,32], index: 18, kind: output, shape index: {0}]   ;;  %s1129_s19 = inlined_call_operand.hbm [shape: f32[8,8], index: 19, kind: output, shape index: {1}]   ;;  %s1130_s20 = inlined_call_operand.hbm [shape: f32[8,8], index: 20, kind: output, shape index: {2}]   ;;  %s1131_s21 = inlined_call_operand.hbm [shape: f32[8,8], index: 21, kind: output, shape index: {3}]  }
   0x1   :  { %1133 = sst [smem:[#allocation12_spill]] %s1110_s0 }
   0x2   :  { %1134 = sst [smem:[#allocation13_spill]] %s1111_s1 }
   0x3   :  { %1135 = sst [smem:[#allocation14_spill]] %s1112_s2 }
   0x4   :  { %1136 = sst [smem:[#allocation15_spill]] %s1113_s3 }
   0x5   :  { %1137 = sst [smem:[#allocation16_spill]] %s1114_s4 }
   0x6   :  { %1138 = sst [smem:[#allocation17_spill]] %s1115_s5 }
   0x7   :  { %27 = vsyncpa [#allocation3], 0 }
   0x8   :  { %28 = vsyncpa [#allocation5], 0  ;;  %s1139_s26 = sld [smem:[#allocation14_spill]]  ;;  %v853_v3 = vmov 0.0|0.0   ;;  %vm854_vm0 = vmmov 0   ;;  %v855_v6 = vmov 0.0  }
   0x9   :  { %727 = vmatprep.subr.bf16.mxu0 %v853_v3  ;;  %698 = vmatprep.mubr.msk.f32.mxu0 %vm854_vm0, %v855_v6 }
   0xa   :  { %733 = vmatprep.subr.bf16.mxu1 %v853_v3  ;;  %705 = vmatprep.mubr.msk.f32.mxu1 %vm854_vm0, %v855_v6 }
   0xe   :  { %v67_v0 = vld [vmem:[%s1139_s26] sm:$0xff]  ;;  %v68_v1 = vld [vmem:[%s1139_s26 + $0x8] sm:$0xff]  ;;  %v69_v2 = vld [vmem:[%s1139_s26 + $0x10] sm:$0xff] }
   0xf   :  { %v728_v4 = vpack.c.bf16 %v68_v1, %v67_v0  ;;  %v70_v5 = vld [vmem:[%s1139_s26 + $0x18] sm:$0xff] }
  0x10   :  { %29 = vsyncpa [#allocation8], 0  ;;  %v731_v7 = vpack.c.bf16 %v70_v5, %v69_v2  ;;  %s1140_s22 = sld [smem:[#allocation12_spill]]  ;;  %vm80_vm1 = vcmask 261120   ;;  %v192_v9 = vld [vmem:[%s1116_s6] sm:$0xff]  ;;  %v193_v10 = vld [vmem:[%s1116_s6 + $0x8] sm:$0xff] }
  0x11   :  { %729 = vmatpush3.bf16.msra.mxu0 %v728_v4  ;;  %v734_v11 = vpack.c.bf16 %v193_v10, %v192_v9  ;;  %s1141_s27 = sld [smem:[#allocation15_spill]]  ;;  %vm154_vm2 = vcmask 130048   ;;  %s1142_s28 = sld [smem:[#allocation16_spill]]  ;;  %v274_v40 = vld [vmem:[%s1118_s8] sm:$0xff]  ;;  %v275_v41 = vld [vmem:[%s1118_s8 + $0x8] sm:$0xff]  ;;  %vm369_vm3 = vcmask 64512  }
  0x12   :  { %730 = vmatprep.subr.bf16.mxu0 %v853_v3  ;;  %s1143_s4 = sld [smem:[#allocation17_spill]]  ;;  %v737_v43 = vpack.c.bf16 %v275_v41, %v274_v40  ;;  %v359_v45 = vld [vmem:[%s1120_s10] sm:$0xff]  ;;  %v480_v61 = vld [vmem:[%s1124_s14 + $0x8] sm:$0xff]  ;;  %s856_s5 = smov [#allocation4]  }
  0x13   :  { %735 = vmatpush3.bf16.msra.mxu1 %v734_v11  ;;  %v662_v46 = vld [vmem:[%s1117_s7] ss:$0 sm:$0xff] }
  0x14   :  { %736 = vmatprep.subr.bf16.mxu1 %v853_v3  ;;  %v664_v50 = vld [vmem:[%s1119_s9] ss:$0 sm:$0xff] }
  0x15   :  { %732 = vmatpush3.bf16.msra.mxu0 %v731_v7  ;;  %v479_v60 = vld [vmem:[%s1124_s14] sm:$0xff] }
  0x16   :  { %v66_v8 = vld [vmem:[%s1140_s22] sm:$0xff]  ;;  %715 = vmatprep.subr.mxu0 %v855_v6  ;;  %v740_v62 = vpack.c.bf16 %v480_v61, %v479_v60  ;;  %s619_s22 = sshll.u32 %s856_s5, 4  ;;  %s620_s22 = int_to_ptr.vmem [resolvable:$true] %s619_s22 }
  0x17   :  { %v658_v12 = vld [vmem:[%s1141_s27] ss:$0 sm:$0xff]  ;;  %s1144_s27 = sld [smem:[#allocation13_spill]]  ;;  %s759_s23 = scalar_lea.vmem %s620_s22, 128 }
  0x18   :  { %699 = vmatmul.mubr.msk.f32.vlgmr.msra.gmra.mrb[0].mxu0 %vm80_vm1, %v66_v8  ;;  %v660_v36 = vld [vmem:[%s1142_s28] ss:$0 sm:$0xff]  ;;  %p760_p0 = scmp.ne.s32.totalorder %s620_s22, %s759_s23  ;;  %p764_p1 = scmp.lt.s32.totalorder %s620_s22, %s620_s22 }
  0x19   :  { %717 = vmatprep.mubr.msk.f32.mxu0 %vm854_vm0, %v855_v6  ;;  %v661_v38 = vld [vmem:[%s1143_s4] ss:$0 sm:$0xff]  ;;  %716 = vmatpush3.msra.mxu0 %v359_v45  ;;  %p765_p2 = scmp.lt.s32.totalorder %s759_s23, %s759_s23 }
  0x1a   :  { %v666_v63 = vld [vmem:[%s1121_s11] ss:$0 sm:$0xff] }
  0x1b   :  { %p766_p3 = por %p765_p2, %p764_p1 }
  0x1d   :  { %v353_v56 = vld [vmem:[%s1144_s27] sm:$0xff]  ;;  %p767_p4 = pnand %p766_p3, %p760_p0 }
  0xeb   :  { %v150_v13 = vpop.f32.mrb[0].mxu0 }
  0xec   :  { %v151_v14 = vadd.f32 %v658_v12, %v150_v13  ;;  %v700_v15 = vpop.f32.mrb[1].mxu0 }
  0xee   :  { %v155_v16 = vsel %vm154_vm2, %v151_v14, 0.0 }
  0xef   :  { %v156_v17 = vrot.slane %v155_v16, 4 }
  0xf1   :  { %v157_v18 = vadd.f32 %v156_v17, %v155_v16 }
  0xf3   :  { %v158_v19 = vrot.slane %v157_v18, 2 }
  0xf5   :  { %v159_v20 = vadd.f32 %v158_v19, %v157_v18 }
  0xf7   :  { %v160_v21 = vrot.slane %v159_v20, 1 }
  0xf9   :  { %v161_v22 = vadd.f32 %v160_v21, %v159_v20 }
  0xfb   :  { %v163_v23 = vmul.f32 0.125, %v161_v22 }
  0xfd   :  { %v164_v24 = vsub.f32 %v151_v14, %v163_v23  ;;  %v668_v23 = vld [vmem:[%s1122_s12] ss:$0 sm:$0xff] }
  0xff   :  { %v165_v25 = vmul.f32 %v164_v24, %v164_v24 }
 0x101   :  { %v166_v26 = vsel %vm154_vm2, %v165_v25, 0.0  ;;  %v669_v25 = vld [vmem:[%s1123_s13] ss:$0 sm:$0xff] }
 0x102   :  { %v167_v27 = vrot.slane %v166_v26, 4 }
 0x104   :  { %v168_v28 = vadd.f32 %v167_v27, %v166_v26 }
 0x106   :  { %v169_v29 = vrot.slane %v168_v28, 2 }
 0x108   :  { %v170_v30 = vadd.f32 %v169_v29, %v168_v28 }
 0x10a   :  { %v171_v31 = vrot.slane %v170_v30, 1 }
 0x10c   :  { %v172_v32 = vadd.f32 %v171_v31, %v170_v30 }
 0x10e   :  { %v173_v33 = vmul.f32 0.125, %v172_v32 }
 0x110   :  { %v174_v34 = vadd.f32 1e-05, %v173_v33 }
 0x112   :  { %749 = vrsqrt.f32 %v174_v34 }
 0x11c   :  { %v750_v35 = vpop.eup %749 }
 0x11d   :  { %v176_v37 = vmul.f32 %v750_v35, %v164_v24 }
 0x11f   :  { %v183_v39 = vmul.f32 %v660_v36, %v176_v37 }
 0x121   :  { %v190_v42 = vadd.f32 %v661_v38, %v183_v39 }
 0x123   :  { %v191_v44 = vmax.f32 %v190_v42, 0.0 }
 0x125   :  { %706 = vmatmul.mubr.msk.f32.vlgmr.msra.gmra.mrb[0].mxu1 %vm154_vm2, %v191_v44 }
 0x126   :  { %738 = vmatpush3.bf16.msra.mxu1 %v737_v43  ;;  %712 = vmatprep.mubr.msk.f32.mxu1 %vm854_vm0, %v855_v6 }
 0x127   :  { %739 = vmatprep.subr.bf16.mxu1 %v853_v3 }
 0x129   :  { %713 = vmatmul.mubr.msk.f32.vlgmr.msra.gmra.mrb[2].mxu1 %vm154_vm2, %v191_v44 }
 0x12a   :  { %724 = vmatprep.mubr.msk.f32.mxu1 %vm854_vm0, %v855_v6  ;;  %741 = vmatpush3.bf16.msra.mxu1 %v740_v62 }
 0x1f8   :  { %v270_v47 = vpop.f32.mrb[0].mxu1 }
 0x1f9   :  { %v271_v48 = vadd.f32 %v662_v46, %v270_v47  ;;  %v707_v49 = vpop.f32.mrb[1].mxu1 }
 0x1fb   :  { %600 = vst.msk [vmem:[#allocation4] sm:$0xff] %vm369_vm3, %v271_v48 }
 0x1fc   :  { %v349_v51 = vpop.f32.mrb[2].mxu1 }
 0x1fd   :  { %v350_v52 = vadd.f32 %v664_v50, %v349_v51  ;;  %v714_v53 = vpop.f32.mrb[3].mxu1 }
 0x1ff   :  { %v354_v54 = vmul.f32 0.5, %v350_v52  ;;  %601 = vst.msk [vmem:[#allocation6] sm:$0xff] %vm369_vm3, %v350_v52 }
 0x201   :  { %v355_v55 = vmul.f32 1.442695, %v354_v54 }
 0x203   :  { %751 = vpow2.f32 %v355_v55 }
 0x20d   :  { %v752_v57 = vpop.eup %751 }
 0x20e   :  { %v357_v58 = vmul.f32 %v752_v57, %v353_v56 }
 0x210   :  { %v358_v59 = vadd.f32 %v357_v58, %v271_v48 }
 0x212   :  { %718 = vmatmul.mubr.msk.f32.vlgmr.msra.gmra.mrb[2].mxu0 %vm369_vm3, %v358_v59  ;;  %602 = vst.msk [vmem:[#allocation7] sm:$0xff] %vm369_vm3, %v358_v59 }
 0x2e5   :  { %v439_v0 = vpop.f32.mrb[2].mxu0 }
 0x2e6   :  { %v440_v1 = vadd.f32 %v666_v63, %v439_v0  ;;  %v719_v2 = vpop.f32.mrb[3].mxu0 }
 0x2e8   :  { %v443_v3 = vsel %vm154_vm2, %v440_v1, 0.0 }
 0x2e9   :  { %v444_v4 = vrot.slane %v443_v3, 4 }
 0x2eb   :  { %v445_v5 = vadd.f32 %v444_v4, %v443_v3 }
 0x2ed   :  { %v446_v6 = vrot.slane %v445_v5, 2 }
 0x2ef   :  { %v447_v7 = vadd.f32 %v446_v6, %v445_v5 }
 0x2f1   :  { %v448_v8 = vrot.slane %v447_v7, 1 }
 0x2f3   :  { %v449_v9 = vadd.f32 %v448_v8, %v447_v7 }
 0x2f5   :  { %v450_v10 = vmul.f32 0.125, %v449_v9 }
 0x2f7   :  { %v451_v11 = vsub.f32 %v440_v1, %v450_v10 }
 0x2f9   :  { %v452_v12 = vmul.f32 %v451_v11, %v451_v11 }
 0x2fb   :  { %v453_v13 = vsel %vm154_vm2, %v452_v12, 0.0 }
 0x2fc   :  { %v454_v14 = vrot.slane %v453_v13, 4 }
 0x2fe   :  { %v455_v15 = vadd.f32 %v454_v14, %v453_v13 }
 0x300   :  { %v456_v16 = vrot.slane %v455_v15, 2 }
 0x302   :  { %v457_v17 = vadd.f32 %v456_v16, %v455_v15 }
 0x304   :  { %v458_v18 = vrot.slane %v457_v17, 1 }
 0x306   :  { %v459_v19 = vadd.f32 %v458_v18, %v457_v17 }
 0x308   :  { %v460_v20 = vmul.f32 0.125, %v459_v19 }
 0x30a   :  { %v461_v21 = vadd.f32 1e-05, %v460_v20 }
 0x30c   :  { %753 = vrsqrt.f32 %v461_v21 }
 0x316   :  { %v754_v22 = vpop.eup %753 }
 0x317   :  { %v463_v24 = vmul.f32 %v754_v22, %v451_v11 }
 0x319   :  { %v470_v26 = vmul.f32 %v668_v23, %v463_v24 }
 0x31b   :  { %v477_v27 = vadd.f32 %v669_v25, %v470_v26 }
 0x31d   :  { %v478_v28 = vmax.f32 %v477_v27, 0.0 }
 0x31f   :  { %725 = vmatmul.mubr.msk.f32.vlgmr.msra.gmra.mrb[4].mxu1 %vm154_vm2, %v478_v28 }
 0x320   :  { %770 = shalt.err (!%p767_p4)
}
 0x321   :  { %s771_s24 = scalar_lea.hbm %s1129_s19, 128 }
 0x322   :  { %p772_p5 = scmp.ne.s32.totalorder %s1129_s19, %s771_s24  ;;  %p775_p6 = scmp.lt.u32.totalorder %s771_s24, %s1129_s19 }
 0x324   :  { %p777_p7 = pnand %p775_p6, %p772_p5 }
 0x326   :  { %780 = shalt.err (!%p777_p7)
}
 0x327   :  { %622 = dma.vmem_to_hbm [thread:$0]  %s620_s22, 128, %s1129_s19, [#allocation5]  }
 0x328   :  { %s857_s7 = smov [#allocation6]   ;;  %s858_s9 = smov [#allocation7]  }
 0x329   :  { %s629_s27 = sshll.u32 %s857_s7, 4  ;;  %s639_s6 = sshll.u32 %s858_s9, 4  ;;  %s630_s27 = int_to_ptr.vmem [resolvable:$true] %s629_s27  ;;  %s640_s6 = int_to_ptr.vmem [resolvable:$true] %s639_s6 }
 0x32a   :  { %s781_s3 = scalar_lea.vmem %s630_s27, 128  ;;  %p786_p9 = scmp.lt.s32.totalorder %s630_s27, %s630_s27 }
 0x32b   :  { %p782_p8 = scmp.ne.s32.totalorder %s630_s27, %s781_s3  ;;  %p787_p10 = scmp.lt.s32.totalorder %s781_s3, %s781_s3 }
 0x32d   :  { %p788_p11 = por %p787_p10, %p786_p9 }
 0x32f   :  { %p789_p12 = pnand %p788_p11, %p782_p8 }
 0x331   :  { %792 = shalt.err (!%p789_p12)
}
 0x332   :  { %s793_s0 = scalar_lea.hbm %s1130_s20, 128 }
 0x333   :  { %p794_p13 = scmp.ne.s32.totalorder %s1130_s20, %s793_s0  ;;  %p797_p0 = scmp.lt.u32.totalorder %s793_s0, %s1130_s20 }
 0x335   :  { %p799_p1 = pnand %p797_p0, %p794_p13 }
 0x337   :  { %802 = shalt.err (!%p799_p1)
}
 0x338   :  { %632 = dma.vmem_to_hbm [thread:$0]  %s630_s27, 128, %s1130_s20, [#allocation5]  }
 0x339   :  { %s803_s22 = scalar_lea.vmem %s640_s6, 128  ;;  %p808_p3 = scmp.lt.s32.totalorder %s640_s6, %s640_s6 }
 0x33a   :  { %p804_p2 = scmp.ne.s32.totalorder %s640_s6, %s803_s22  ;;  %p809_p4 = scmp.lt.s32.totalorder %s803_s22, %s803_s22 }
 0x33c   :  { %p810_p5 = por %p809_p4, %p808_p3 }
 0x33e   :  { %p811_p6 = pnand %p810_p5, %p804_p2 }
 0x340   :  { %814 = shalt.err (!%p811_p6)
}
 0x341   :  { %s815_s1 = scalar_lea.hbm %s1131_s21, 128 }
 0x342   :  { %p816_p7 = scmp.ne.s32.totalorder %s1131_s21, %s815_s1  ;;  %p819_p8 = scmp.lt.u32.totalorder %s815_s1, %s1131_s21 }
 0x344   :  { %p821_p9 = pnand %p819_p8, %p816_p7 }
 0x346   :  { %824 = shalt.err (!%p821_p9)
}
 0x347   :  { %642 = dma.vmem_to_hbm [thread:$0]  %s640_s6, 128, %s1131_s21, [#allocation8]   ;;  %v670_v29 = vld [vmem:[%s1125_s15] ss:$0 sm:$0xff] }
 0x348   :  { %v672_v53 = vld [vmem:[%s1126_s16] ss:$0 sm:$0xff]  ;;  %s859_s9 = smov [#allocation2]  }
 0x349   :  { %v673_v55 = vld [vmem:[%s1127_s17] ss:$0 sm:$0xff]  ;;  %s609_s6 = sshll.u32 %s859_s9, 4  ;;  %s610_s6 = int_to_ptr.vmem [resolvable:$true] %s609_s6 }
 0x34a   :  { %s825_s3 = scalar_lea.vmem %s610_s6, 128  ;;  %p830_p11 = scmp.lt.s32.totalorder %s610_s6, %s610_s6 }
 0x34b   :  { %p826_p10 = scmp.ne.s32.totalorder %s610_s6, %s825_s3  ;;  %p831_p12 = scmp.lt.s32.totalorder %s825_s3, %s825_s3 }
 0x34d   :  { %p832_p13 = por %p831_p12, %p830_p11 }
 0x34f   :  { %p833_p0 = pnand %p832_p13, %p826_p10 }
 0x3f2   :  { %v559_v30 = vpop.f32.mrb[4].mxu1 }
 0x3f3   :  { %v560_v31 = vadd.f32 %v670_v29, %v559_v30  ;;  %v726_v32 = vpop.f32.mrb[5].mxu1 }
 0x3f5   :  { %v563_v33 = vsel %vm80_vm1, %v560_v31, 0.0 }
 0x3f6   :  { %v564_v34 = vrot.slane %v563_v33, 4 }
 0x3f8   :  { %v565_v35 = vadd.f32 %v564_v34, %v563_v33 }
 0x3fa   :  { %v566_v36 = vrot.slane %v565_v35, 2 }
 0x3fc   :  { %v567_v37 = vadd.f32 %v566_v36, %v565_v35 }
 0x3fe   :  { %v568_v38 = vrot.slane %v567_v37, 1 }
 0x400   :  { %v569_v39 = vadd.f32 %v568_v38, %v567_v37 }
 0x402   :  { %v570_v40 = vmul.f32 0.125, %v569_v39 }
 0x404   :  { %v571_v41 = vsub.f32 %v560_v31, %v570_v40 }
 0x406   :  { %v572_v42 = vmul.f32 %v571_v41, %v571_v41 }
 0x408   :  { %v573_v43 = vsel %vm80_vm1, %v572_v42, 0.0 }
 0x409   :  { %v574_v44 = vrot.slane %v573_v43, 4 }
 0x40b   :  { %v575_v45 = vadd.f32 %v574_v44, %v573_v43 }
 0x40d   :  { %v576_v46 = vrot.slane %v575_v45, 2 }
 0x40f   :  { %v577_v47 = vadd.f32 %v576_v46, %v575_v45 }
 0x411   :  { %v578_v48 = vrot.slane %v577_v47, 1 }
 0x413   :  { %v579_v49 = vadd.f32 %v578_v48, %v577_v47 }
 0x415   :  { %v580_v50 = vmul.f32 0.125, %v579_v49 }
 0x417   :  { %v581_v51 = vadd.f32 1e-05, %v580_v50 }
 0x419   :  { %755 = vrsqrt.f32 %v581_v51 }
 0x423   :  { %v756_v52 = vpop.eup %755 }
 0x424   :  { %v583_v54 = vmul.f32 %v756_v52, %v571_v41 }
 0x426   :  { %v590_v56 = vmul.f32 %v672_v53, %v583_v54 }
 0x428   :  { %v597_v57 = vadd.f32 %v673_v55, %v590_v56 }
 0x42a   :  { %757 = vtanh.f32 %v597_v57 }
 0x434   :  { %v758_v58 = vpop.eup %757 }
 0x435   :  { %599 = vst.msk [vmem:[#allocation2] sm:$0xff] %vm80_vm1, %v758_v58 }
 0x436   :  { %836 = shalt.err (!%p833_p0)
}
 0x437   :  { %s837_s17 = scalar_lea.hbm %s1128_s18, 128 }
 0x438   :  { %p838_p1 = scmp.ne.s32.totalorder %s1128_s18, %s837_s17  ;;  %p841_p2 = scmp.lt.u32.totalorder %s837_s17, %s1128_s18 }
 0x43a   :  { %p843_p3 = pnand %p841_p2, %p838_p1 }
 0x43c   :  { %846 = shalt.err (!%p843_p3)
}
 0x43d   :  { %612 = dma.vmem_to_hbm [thread:$0]  %s610_s6, 128, %s1128_s18, [#allocation3]  }
 0x43e   :  { %847 = dma.done.wait [#allocation3], 128  }
 0x43f   :  { %848 = vsyncadd [#allocation3], 4294967168 }
 0x440   :  { %849 = dma.done.wait [#allocation5], 256  }
 0x441   :  { %850 = vsyncadd [#allocation5], 4294967040 }
 0x442   :  { %851 = dma.done.wait [#allocation8], 128  }
 0x443   :  { %852 = vsyncadd [#allocation8], 4294967168 }
 0x444   :  { %655 = vsyncpa [#allocation3], 1 }
 0x445   :  { %656 = vsyncpa [#allocation5], 1 }
 0x446   :  { %657 = vsyncpa [#allocation8], 1 }

</bundles_post_ra>
